<compile_context>
chip_gen: v5e
topology: v5e:2x2
jax: 0.10.0
libtpu: 0.0.40
codegen_flags: <defaults>
</compile_context>

<pallas_src>
import functools

import jax
import jax.numpy as jnp
from jax.experimental import pallas as pl
from jax.experimental.pallas import tpu as pltpu


# ---------------------------------------------------------------------------
# Fused Pallas kernel: y = act_N(... act_1(act_0(x @ W0 + b0) @ W1 + b1) ... )
# ---------------------------------------------------------------------------
def _apply_activation(y, activation):
    if activation is None:
        return y
    if activation == "relu":
        return jnp.maximum(y, 0.0)
    if activation == "sigmoid":
        return jax.nn.sigmoid(y)          # EUP transcendentals, f32
    if activation == "tanh":
        return jnp.tanh(y)
    raise ValueError(f"unknown activation {activation!r}")


def _fused_decoder_kernel(*refs, activations):
    # refs = (x_ref, w0, b0, w1, b1, ..., wN, bN, o_ref)
    x_ref, *param_refs, o_ref = refs
    n_layers = len(param_refs) // 2

    y = x_ref[...]                                      # (B, f_in), f32 or bf16
    for i in range(n_layers):
        w = param_refs[2 * i][...]                      # (f_in_i, f_out_i)
        b = param_refs[2 * i + 1][...]                  # (1, f_out_i)
        if w.dtype == jnp.bfloat16:
            y = y.astype(jnp.bfloat16)                  # bf16 MXU operands, f32 acc
        y = jnp.dot(y, w, preferred_element_type=jnp.float32) + b.astype(jnp.float32)
        y = _apply_activation(y, activations[i])
    o_ref[...] = y.astype(o_ref.dtype)


def _round_up(n, m):
    return ((n + m - 1) // m) * m


def _num_tensorcores_per_chip():
    """Megacore-aware core count: v4/v5p/v7x expose 2 TensorCores to a 'parallel' grid."""
    try:
        kind = jax.devices()[0].device_kind.lower()
    except Exception:
        return 1
    if any(tag in kind for tag in ("v4", "v5p", "7")):
        return 2
    return 1


def _fold_affine_layers(params, activations):
    """Trace-time fold of adjacent Linear layers with no activation between them."""
    params = list(params)
    folded_p = [params[0]]
    folded_a = [activations[0]]
    for (w, b), act in zip(params[1:], activations[1:]):
        if folded_a[-1] is None:
            wp, bp = folded_p[-1]
            folded_p[-1] = (wp @ w, bp @ w + b)
            folded_a[-1] = act
        else:
            folded_p.append((w, b))
            folded_a.append(act)
    return folded_p, tuple(folded_a)


def _fused_forward(x, params, activations, *, batch_tile=2048, bf16_inputs=False):
    """x: (B, f_in); params: list of (W (f_in,f_out), b (1,f_out)). Returns (B, out_size)."""
    B, f_in = x.shape
    out_dtype = x.dtype

    # Fold activation-free layer runs into a single matmul (the default config folds
    # the whole stack into one (B,32)@(32,16) + bias).
    params, activations = _fold_affine_layers(params, tuple(activations))
    f_out = params[-1][0].shape[1]

    n_cores = _num_tensorcores_per_chip()
    # Generation-aware switch point: v7x flips to the tiled "parallel" path sooner so
    # both TensorCores get work; v5e/v6e (1 TC) stay grid-less longer.
    single_block_max = (2 if n_cores > 1 else 4) * batch_tile

    if B <= single_block_max:
        # ---- grid-less single-block path: everything VMEM-resident, no pipeline. ----
        # Lane-dense padded output only for tiny B (extra HBM bytes negligible there).
        pad_out = B <= 1024
        if pad_out and f_out % 128 != 0:
            f_out_k = _round_up(f_out, 128)
            w_last, b_last = params[-1]
            w_last = jnp.pad(w_last, ((0, 0), (0, f_out_k - f_out)))
            b_last = jnp.pad(b_last, ((0, 0), (0, f_out_k - f_out)))
            params = params[:-1] + [(w_last, b_last)]
        else:
            f_out_k = f_out

        flat_params = []
        for (w, b) in params:
            flat_params += [w, b]
        kernel = functools.partial(_fused_decoder_kernel, activations=activations)

        out = pl.pallas_call(
            kernel,
            out_shape=jax.ShapeDtypeStruct((B, f_out_k), out_dtype),
            in_specs=[pl.BlockSpec(memory_space=pltpu.MemorySpace.VMEM)]
            * (1 + len(flat_params)),
            out_specs=pl.BlockSpec(memory_space=pltpu.MemorySpace.VMEM),
        )(x, *flat_params)
        return out[:, :f_out] if f_out_k != f_out else out

    # ---- batch-tiled streamed path for large B ----
    # Stream x / out over a 1-D batch grid, keep weights VMEM-resident via constant
    # index_maps; batch axis "parallel" so megacore / v7x's 2 TCs split the grid.
    tb = max(8, (batch_tile // 8) * 8)
    # Keep >= ~4 grid steps per core so the megacore split and pipeline have work,
    # but never below 512 rows (per-step overhead ~0.35 us).
    while tb > 512 and pl.cdiv(B, tb) < 4 * n_cores:
        tb //= 2

    if bf16_inputs:
        # Halve x DMA bytes / double MXU issue rate (v6e/v7x); f32 accumulation kept.
        x = x.astype(jnp.bfloat16)
        params = [(w.astype(jnp.bfloat16), b) for (w, b) in params]

    flat_params = []
    for (w, b) in params:
        flat_params += [w, b]
    kernel = functools.partial(_fused_decoder_kernel, activations=activations)

    in_specs = [pl.BlockSpec((tb, f_in), lambda i: (i, 0))]
    for (w, b) in params:
        in_specs.append(pl.BlockSpec(w.shape, lambda i: (0, 0)))
        in_specs.append(pl.BlockSpec(b.shape, lambda i: (0, 0)))

    # True f_out output width (no 128-lane padding) and ragged last block handled by
    # Pallas (grid = cdiv): no wrapper pad/slice passes over HBM.
    out = pl.pallas_call(
        kernel,
        out_shape=jax.ShapeDtypeStruct((B, f_out), out_dtype),
        grid=(pl.cdiv(B, tb),),
        in_specs=in_specs,
        out_specs=pl.BlockSpec((tb, f_out), lambda i: (i, 0)),
        compiler_params=pltpu.CompilerParams(
            dimension_semantics=("parallel",),
        ),
    )(x, *flat_params)
    return out


# ---------------------------------------------------------------------------
# DenseDecoder in JAX (parameter setup is glue; hot path is the fused kernel)
# ---------------------------------------------------------------------------
def init_dense_decoder_params(key, dec_sizes, out_size, bias=True):
    """Deterministic parameter init. Returns list of (W (f_in,f_out), b (1,f_out))."""
    sizes = list(zip(dec_sizes, dec_sizes[1:])) + [(dec_sizes[-1], out_size)]
    params = []
    for (f_in, f_out) in sizes:
        key, kw, kb = jax.random.split(key, 3)
        bound = 1.0 / jnp.sqrt(jnp.float32(f_in))  # matches PyTorch 1/sqrt(f_in)
        w = jax.random.uniform(kw, (f_in, f_out), jnp.float32, -bound, bound)
        if bias:
            b = jax.random.uniform(kb, (1, f_out), jnp.float32, -bound, bound)
        else:
            b = jnp.zeros((1, f_out), jnp.float32)
        params.append((w, b))
    return params


@functools.partial(
    jax.jit,
    static_argnames=("decoder_activation", "final_activation", "batch_tile", "bf16_inputs"),
)
def dense_decoder_forward(x, params, decoder_activation=None, final_activation=None,
                          batch_tile=2048, bf16_inputs=False):
    n_layers = len(params)
    activations = tuple([decoder_activation] * (n_layers - 1) + [final_activation])
    return _fused_forward(x, params, activations,
                          batch_tile=batch_tile, bf16_inputs=bf16_inputs)


def dense_decoder_reference(x, params, decoder_activation=None, final_activation=None):
    """Pure-JAX reference for correctness checking."""
    for (w, b) in params[:-1]:
        x = _apply_activation(x @ w + b, decoder_activation)
    w, b = params[-1]
    return _apply_activation(x @ w + b, final_activation)


if __name__ == "__main__":
    # Module config (defaults: decoder_activation=None, final_activation=None, bias=True)
    dec_sizes = (32, 64, 48)
    out_size = 16

    key = jax.random.PRNGKey(0)
    kx, kp, kx2 = jax.random.split(key, 3)

    params = init_dense_decoder_params(kp, dec_sizes, out_size, bias=True)

    # --- Test 1: default config (no activations) -> layer stack folds into a single
    #     affine map; small batch -> grid-less single-block VMEM kernel.
    batch = 8
    x = jax.random.normal(kx, (batch, dec_sizes[0]), jnp.float32)
    out = dense_decoder_forward(x, params)
    out = jax.block_until_ready(out)
    ref = dense_decoder_reference(x, params)
    assert out.shape == (batch, out_size), out.shape
    assert jnp.allclose(out, ref, atol=1e-4, rtol=1e-4), "mismatch (folded / single-block)"

    # --- Test 2: activations on (no folding), batch large relative to the (overridden)
    #     batch_tile -> batch-tiled "parallel" streamed path with a ragged last block.
    batch2 = 1000
    x2 = jax.random.normal(kx2, (batch2, dec_sizes[0]), jnp.float32)
    out2 = dense_decoder_forward(
        x2, params,
        decoder_activation="relu", final_activation="sigmoid",
        batch_tile=128,
    )
    out2 = jax.block_until_ready(out2)
    ref2 = dense_decoder_reference(
        x2, params, decoder_activation="relu", final_activation="sigmoid")
    assert out2.shape == (batch2, out_size), out2.shape
    assert jnp.allclose(out2, ref2, atol=1e-5, rtol=1e-5), "mismatch (tiled path)"

    print("KERNEL_OK")
</pallas_src>

<mosaic_0001>
module attributes {stable_mosaic.version = 11 : i64} {
  func.func @_fused_decoder_kernel(%arg0: memref<8x32xf32, #tpu.memory_space<vmem>>, %arg1: memref<32x128xf32, #tpu.memory_space<vmem>>, %arg2: memref<1x128xf32, #tpu.memory_space<vmem>>, %arg3: memref<8x128xf32, #tpu.memory_space<vmem>>) attributes {dimension_semantics = [], scalar_prefetch = 0 : i64, scratch_operands = 0 : i64, tpu.core_type = #tpu.core_type<tc>} {
    %c0 = arith.constant 0 : index
    %c0_0 = arith.constant 0 : index
    %0 = vector.load %arg0[%c0, %c0_0] : memref<8x32xf32, #tpu.memory_space<vmem>>, vector<8x32xf32>
    %c0_1 = arith.constant 0 : index
    %c0_2 = arith.constant 0 : index
    %1 = vector.load %arg1[%c0_1, %c0_2] : memref<32x128xf32, #tpu.memory_space<vmem>>, vector<32x128xf32>
    %c0_3 = arith.constant 0 : index
    %c0_4 = arith.constant 0 : index
    %2 = vector.load %arg2[%c0_3, %c0_4] : memref<1x128xf32, #tpu.memory_space<vmem>>, vector<1x128xf32>
    %cst = arith.constant dense<0.000000e+00> : vector<8x128xf32>
    %3 = tpu.matmul %0, %1, %cst {dimension_numbers = #tpu.dot_dimension_numbers<[1], [0], [0], [1], [0, 0, 1, 1], [], []>} : vector<8x32xf32>, vector<32x128xf32>, vector<8x128xf32> -> vector<8x128xf32>
    %4 = vector.broadcast %2 : vector<1x128xf32> to vector<8x128xf32>
    %5 = arith.addf %3, %4 : vector<8x128xf32>
    %c0_5 = arith.constant 0 : index
    %c0_6 = arith.constant 0 : index
    %6 = vector.load %arg3[%c0_5, %c0_6] : memref<8x128xf32, #tpu.memory_space<vmem>>, vector<8x128xf32>
    tpu.vector_store %arg3[%c0_5, %c0_6], %5 {strides = array<i32>} : memref<8x128xf32, #tpu.memory_space<vmem>>, vector<8x128xf32>,
    return
  }
}

</mosaic_0001>

<bundles_post_ra>
// kernel: dense_decoder_forward.1
= control target key start
LH: loop header
LB: loop body
LE: loop exit
PB: predicated region body
PF: predicated region fallthrough
CT: control target
= control target key end

     0   :  { %s136_s0 = inlined_call_operand.vmem [shape: f32[8,32], index: 0, kind: input, shape index: {}]   ;;  %s137_s1 = inlined_call_operand.vmem [shape: f32[32,128], index: 1, kind: input, shape index: {}]   ;;  %s138_s2 = inlined_call_operand.vmem [shape: f32[1,128], index: 2, kind: input, shape index: {}]   ;;  %s139_s3 = inlined_call_operand.hbm [shape: f32[8,128], index: 3, kind: output, shape index: {}]  }
   0x1   :  { %v19_v0 = vld [vmem:[%s137_s1 + $0x18] sm:$0xff]  ;;  %v18_v1 = vld [vmem:[%s137_s1 + $0x10] sm:$0xff]  ;;  %v17_v2 = vld [vmem:[%s137_s1 + $0x8] sm:$0xff] }
   0x2   :  { %40 = vmatpush.msra.mxu0 %v19_v0 }
   0x3   :  { %8 = vsyncpa [#allocation3], 0  ;;  %v16_v3 = vld [vmem:[%s137_s1] sm:$0xff]  ;;  %vm24_vm0 = vcmask 261120   ;;  %s94_s24 = smov [#allocation2]   ;;  %s56_s28 = sshll.u32 %s139_s3, 4  ;;  %s57_s28 = int_to_ptr.hbm [resolvable:$true] %s56_s28 }
   0x4   :  { %41 = vmatpush.msra.mxu0 %v18_v1  ;;  %v15_v4 = vld [vmem:[%s136_s0] sm:$0xff]  ;;  %s54_s25 = sshll.u32 %s94_s24, 4  ;;  %s55_s25 = int_to_ptr.vmem [resolvable:$true] %s54_s25 }
   0x5   :  { %v67_v5 = vld [vmem:[%s138_s2] ss:$0 sm:$0xff] }
   0x6   :  { %42 = vmatpush.msra.mxu0 %v17_v2 }
   0x8   :  { %43 = vmatpush.msra.mxu0 %v16_v3 }
   0x9   :  { %65 = vmatmul.msk.f32.vlgmr.msra.gmra.mxu0 %vm24_vm0, %v15_v4 }
  0x86   :  { %v45_v6 = vpop.f32.mrf.mxu0 }
  0x87   :  { %v46_v7 = vadd.f32 %v67_v5, %v45_v6 }
  0x89   :  { %48 = vst [vmem:[#allocation2] sm:$0xff] %v46_v7 }
  0x8a   :  { %59 = dma.vmem_to_hbm [thread:$0]  %s55_s25, 128, %s57_s28, [#allocation3]  }
  0x8b   :  { %92 = dma.done.wait [#allocation3], 128  }
  0x8c   :  { %93 = vsyncadd [#allocation3], 4294967168 }
  0x8d   :  { %64 = vsyncpa [#allocation3], 1 }

</bundles_post_ra>
